<compile_context>
chip_gen: v6e
topology: v6e:2x2x1
jax: 0.10.0
libtpu: 0.0.40
codegen_flags: <defaults>
</compile_context>

<pallas_src>
import functools

import jax
import jax.numpy as jnp
from jax.experimental import pallas as pl
from jax.experimental.pallas import tpu as pltpu


def _self_output_kernel(h_ref, x_ref, w_ref, b_ref, g_ref, beta_ref, o_ref, *,
                        eps):
    # h_ref: [tm, H] bf16 activation tile;  x_ref/o_ref: [tm, H] token tiles;
    # w_ref: [H, H] bf16 (resident);  b_ref/g_ref/beta_ref: [1, H] f32 (resident).

    # Dense: bf16 operands on the MXU, f32 accumulation.
    y = jnp.dot(h_ref[...], w_ref[...],
                preferred_element_type=jnp.float32) + b_ref[...]

    # TODO(synk): dropout omitted (identity at inference; no RNG in the spec).
    z = y + x_ref[...].astype(jnp.float32)           # residual add, f32

    # LayerNorm in f32 (mean / centered variance, rsqrt on the EUP).
    mu = jnp.mean(z, axis=-1, keepdims=True)
    zc = z - mu
    var = jnp.mean(zc * zc, axis=-1, keepdims=True)
    rstd = jax.lax.rsqrt(var + eps)
    out = zc * (rstd * g_ref[...]) + beta_ref[...]

    o_ref[...] = out.astype(o_ref.dtype)


def bert_self_output(hidden_states, input_tensor, weight, bias, gamma, beta, *,
                     eps=1e-12, block_m=None):
    """BertSelfOutput forward.

    hidden_states, input_tensor : [B, S, H]
    weight                      : [H, H]  (pre-transposed: x @ W, i.e. torch W.T)
    bias, gamma, beta           : [1, H]  (f32)
    """
    B, S, H = hidden_states.shape
    N = B * S

    # Lane-dense 2D views built in the wrapper (not inside the kernel).
    # Activation goes over the wire as bf16 (halves its HBM traffic); the
    # residual stays in its input dtype for LN numerics.
    h2 = hidden_states.reshape(N, H).astype(jnp.bfloat16)
    x2 = input_tensor.reshape(N, H)

    # Token tile: biggest aligned divisor of N.  Bigger tiles amortize the
    # ~0.35us per-grid-step overhead; 1024x768 f32 tiles still fit the scoped
    # VMEM default with double buffering.
    if block_m is None:
        block_m = next((t for t in (1024, 512, 256, 128, 64, 32, 16, 8)
                        if N % t == 0), N)
    grid = (N // block_m,)

    w_bf16 = weight.astype(jnp.bfloat16)
    bias_f32 = bias.astype(jnp.float32)
    gamma_f32 = gamma.astype(jnp.float32)
    beta_f32 = beta.astype(jnp.float32)

    tok_spec = pl.BlockSpec((block_m, H), lambda i: (i, 0))
    resident = lambda shape: pl.BlockSpec(shape, lambda i: (0, 0))

    kernel = functools.partial(_self_output_kernel, eps=eps)

    bytes_accessed = (h2.size * 2 + x2.size * 4 + w_bf16.size * 2
                      + 3 * H * 4 + N * H * 4)
    cost = pl.CostEstimate(flops=2 * N * H * H,
                           transcendentals=N,          # one rsqrt per token
                           bytes_accessed=bytes_accessed)

    out2 = pl.pallas_call(
        kernel,
        out_shape=jax.ShapeDtypeStruct((N, H), hidden_states.dtype),
        grid_spec=pltpu.PrefetchScalarGridSpec(
            num_scalar_prefetch=0,
            grid=grid,
            in_specs=[
                tok_spec,                 # hidden_states tile (bf16, pipelined)
                tok_spec,                 # input_tensor tile (pipelined)
                resident((H, H)),         # dense weight (bf16, resident)
                resident((1, H)),         # dense bias
                resident((1, H)),         # LN gamma
                resident((1, H)),         # LN beta
            ],
            out_specs=tok_spec,
        ),
        compiler_params=pltpu.CompilerParams(
            dimension_semantics=("parallel",)),
        cost_estimate=cost,
    )(h2, x2, w_bf16, bias_f32, gamma_f32, beta_f32)

    return out2.reshape(B, S, H)


def _reference(hidden_states, input_tensor, weight, bias, gamma, beta, eps):
    y = jnp.matmul(hidden_states, weight) + bias
    z = y + input_tensor
    mu = jnp.mean(z, axis=-1, keepdims=True)
    var = jnp.mean((z - mu) ** 2, axis=-1, keepdims=True)
    return (z - mu) / jnp.sqrt(var + eps) * gamma + beta


if __name__ == "__main__":
    # Small BERT-like config.
    B, S, H = 2, 8, 32
    LN_EPS = 1e-12

    key = jax.random.PRNGKey(0)
    k_h, k_x, k_w, k_b, k_g, k_bb = jax.random.split(key, 6)

    hidden_states = jax.random.normal(k_h, (B, S, H), jnp.float32)
    input_tensor = jax.random.normal(k_x, (B, S, H), jnp.float32)
    weight = jax.random.normal(k_w, (H, H), jnp.float32) * 0.02   # [in, out]
    bias = jax.random.normal(k_b, (1, H), jnp.float32) * 0.02
    gamma = jnp.ones((1, H), jnp.float32) + \
        jax.random.normal(k_g, (1, H), jnp.float32) * 0.02
    beta = jax.random.normal(k_bb, (1, H), jnp.float32) * 0.02

    out = bert_self_output(hidden_states, input_tensor, weight, bias, gamma,
                           beta, eps=LN_EPS, block_m=8)   # grid=(2,) at toy size
    out = jax.block_until_ready(out)
    assert out.shape == (B, S, H)

    ref = _reference(hidden_states, input_tensor, weight, bias, gamma, beta,
                     LN_EPS)
    assert jnp.allclose(out, ref, atol=5e-2, rtol=5e-2), \
        float(jnp.max(jnp.abs(out - ref)))

    print("KERNEL_OK")
</pallas_src>

<mosaic_0001>
module attributes {stable_mosaic.version = 11 : i64} {
  func.func @_self_output_kernel(%arg0: i32, %arg1: memref<8x32xbf16, #tpu.memory_space<vmem>>, %arg2: memref<8x32xf32, #tpu.memory_space<vmem>>, %arg3: memref<32x32xbf16, #tpu.memory_space<vmem>>, %arg4: memref<1x32xf32, #tpu.memory_space<vmem>>, %arg5: memref<1x32xf32, #tpu.memory_space<vmem>>, %arg6: memref<1x32xf32, #tpu.memory_space<vmem>>, %arg7: memref<8x32xf32, #tpu.memory_space<vmem>>) attributes {dimension_semantics = [#tpu.dimension_semantics<parallel>], iteration_bounds = array<i64: 2>, scalar_prefetch = 0 : i64, scratch_operands = 0 : i64, tpu.core_type = #tpu.core_type<tc>, window_params = [{transform_indices = @transform_0, window_bounds = array<i64: 8, 32>}, {transform_indices = @transform_1, window_bounds = array<i64: 8, 32>}, {pipeline_mode = #tpu.pipeline_mode<synchronous>, transform_indices = @transform_2, window_bounds = array<i64: 32, 32>}, {pipeline_mode = #tpu.pipeline_mode<synchronous>, transform_indices = @transform_3, window_bounds = array<i64: 1, 32>}, {pipeline_mode = #tpu.pipeline_mode<synchronous>, transform_indices = @transform_4, window_bounds = array<i64: 1, 32>}, {pipeline_mode = #tpu.pipeline_mode<synchronous>, transform_indices = @transform_5, window_bounds = array<i64: 1, 32>}, {transform_indices = @transform_6, window_bounds = array<i64: 8, 32>}]} {
    %c0 = arith.constant 0 : index
    %c0_0 = arith.constant 0 : index
    %0 = vector.load %arg1[%c0, %c0_0] : memref<8x32xbf16, #tpu.memory_space<vmem>>, vector<8x32xbf16>
    %c0_1 = arith.constant 0 : index
    %c0_2 = arith.constant 0 : index
    %1 = vector.load %arg3[%c0_1, %c0_2] : memref<32x32xbf16, #tpu.memory_space<vmem>>, vector<32x32xbf16>
    %cst = arith.constant dense<0.000000e+00> : vector<8x32xf32>
    %2 = tpu.matmul %0, %1, %cst {dimension_numbers = #tpu.dot_dimension_numbers<[1], [0], [0], [1], [0, 0, 1, 1], [], []>} : vector<8x32xbf16>, vector<32x32xbf16>, vector<8x32xf32> -> vector<8x32xf32>
    %c0_3 = arith.constant 0 : index
    %c0_4 = arith.constant 0 : index
    %3 = vector.load %arg4[%c0_3, %c0_4] : memref<1x32xf32, #tpu.memory_space<vmem>>, vector<1x32xf32>
    %4 = vector.broadcast %3 : vector<1x32xf32> to vector<8x32xf32>
    %5 = arith.addf %2, %4 : vector<8x32xf32>
    %c0_5 = arith.constant 0 : index
    %c0_6 = arith.constant 0 : index
    %6 = vector.load %arg2[%c0_5, %c0_6] : memref<8x32xf32, #tpu.memory_space<vmem>>, vector<8x32xf32>
    %7 = arith.addf %5, %6 : vector<8x32xf32>
    %cst_7 = arith.constant dense<0.000000e+00> : vector<8xf32>
    %8 = vector.multi_reduction <add>, %7, %cst_7 [1] : vector<8x32xf32> to vector<8xf32>
    %9 = vector.shape_cast %8 : vector<8xf32> to vector<8x1xf32>
    %cst_8 = arith.constant 3.200000e+01 : f32
    %10 = vector.broadcast %cst_8 : f32 to vector<8x1xf32>
    %11 = arith.divf %9, %10 : vector<8x1xf32>
    %12 = vector.broadcast %11 : vector<8x1xf32> to vector<8x32xf32>
    %13 = arith.subf %7, %12 : vector<8x32xf32>
    %14 = arith.mulf %13, %13 : vector<8x32xf32>
    %cst_9 = arith.constant dense<0.000000e+00> : vector<8xf32>
    %15 = vector.multi_reduction <add>, %14, %cst_9 [1] : vector<8x32xf32> to vector<8xf32>
    %16 = vector.shape_cast %15 : vector<8xf32> to vector<8x1xf32>
    %cst_10 = arith.constant 3.200000e+01 : f32
    %17 = vector.broadcast %cst_10 : f32 to vector<8x1xf32>
    %18 = arith.divf %16, %17 : vector<8x1xf32>
    %cst_11 = arith.constant 9.99999996E-13 : f32
    %19 = vector.broadcast %cst_11 : f32 to vector<8x1xf32>
    %20 = arith.addf %18, %19 : vector<8x1xf32>
    %21 = math.rsqrt %20 : vector<8x1xf32>
    %c0_12 = arith.constant 0 : index
    %c0_13 = arith.constant 0 : index
    %22 = vector.load %arg5[%c0_12, %c0_13] : memref<1x32xf32, #tpu.memory_space<vmem>>, vector<1x32xf32>
    %23 = vector.broadcast %21 : vector<8x1xf32> to vector<8x32xf32>
    %24 = vector.broadcast %22 : vector<1x32xf32> to vector<8x32xf32>
    %25 = arith.mulf %23, %24 : vector<8x32xf32>
    %26 = arith.mulf %13, %25 : vector<8x32xf32>
    %c0_14 = arith.constant 0 : index
    %c0_15 = arith.constant 0 : index
    %27 = vector.load %arg6[%c0_14, %c0_15] : memref<1x32xf32, #tpu.memory_space<vmem>>, vector<1x32xf32>
    %28 = vector.broadcast %27 : vector<1x32xf32> to vector<8x32xf32>
    %29 = arith.addf %26, %28 : vector<8x32xf32>
    %c0_16 = arith.constant 0 : index
    %c0_17 = arith.constant 0 : index
    %30 = vector.load %arg7[%c0_16, %c0_17] : memref<8x32xf32, #tpu.memory_space<vmem>>, vector<8x32xf32>
    tpu.vector_store %arg7[%c0_16, %c0_17], %29 {strides = array<i32>} : memref<8x32xf32, #tpu.memory_space<vmem>>, vector<8x32xf32>,
    return
  }
  func.func @transform_0(%arg0: i32) -> (i32, i32) {
    %c0_i32 = arith.constant 0 : i32
    %c0_i32_0 = arith.constant 0 : i32
    return %arg0, %c0_i32 : i32, i32
  }
  func.func @transform_1(%arg0: i32) -> (i32, i32) {
    %c0_i32 = arith.constant 0 : i32
    %c0_i32_0 = arith.constant 0 : i32
    return %arg0, %c0_i32 : i32, i32
  }
  func.func @transform_2(%arg0: i32) -> (i32, i32) {
    %c0_i32 = arith.constant 0 : i32
    %c0_i32_0 = arith.constant 0 : i32
    %c0_i32_1 = arith.constant 0 : i32
    return %c0_i32, %c0_i32_0 : i32, i32
  }
  func.func @transform_3(%arg0: i32) -> (i32, i32) {
    %c0_i32 = arith.constant 0 : i32
    %c0_i32_0 = arith.constant 0 : i32
    %c0_i32_1 = arith.constant 0 : i32
    return %c0_i32, %c0_i32_0 : i32, i32
  }
  func.func @transform_4(%arg0: i32) -> (i32, i32) {
    %c0_i32 = arith.constant 0 : i32
    %c0_i32_0 = arith.constant 0 : i32
    %c0_i32_1 = arith.constant 0 : i32
    return %c0_i32, %c0_i32_0 : i32, i32
  }
  func.func @transform_5(%arg0: i32) -> (i32, i32) {
    %c0_i32 = arith.constant 0 : i32
    %c0_i32_0 = arith.constant 0 : i32
    %c0_i32_1 = arith.constant 0 : i32
    return %c0_i32, %c0_i32_0 : i32, i32
  }
  func.func @transform_6(%arg0: i32) -> (i32, i32) {
    %c0_i32 = arith.constant 0 : i32
    %c0_i32_0 = arith.constant 0 : i32
    return %arg0, %c0_i32 : i32, i32
  }
}

</mosaic_0001>

<bundles_post_ra>
// kernel: tpu_custom_call.1
= control target key start
LH: loop header
LB: loop body
LE: loop exit
PB: predicated region body
PF: predicated region fallthrough
CT: control target
= control target key end

     0   :  { %s1054_s0 = inlined_call_operand.hbm [shape: bf16[16,32], index: 0, kind: input, shape index: {}]   ;;  %s1055_s1 = inlined_call_operand.hbm [shape: f32[16,32], index: 1, kind: input, shape index: {}]   ;;  %s1056_s2 = inlined_call_operand.hbm [shape: bf16[32,32], index: 2, kind: input, shape index: {}]   ;;  %s1057_s3 = inlined_call_operand.vmem [shape: f32[1,32], index: 3, kind: input, shape index: {}]   ;;  %s1058_s4 = inlined_call_operand.vmem [shape: f32[1,32], index: 4, kind: input, shape index: {}]   ;;  %s1059_s5 = inlined_call_operand.vmem [shape: f32[1,32], index: 5, kind: input, shape index: {}]   ;;  %s1060_s6 = inlined_call_operand.hbm [shape: f32[16,32], index: 6, kind: output, shape index: {}]  }
   0x1   :  { %1065 = sst [smem:[#allocation13_spill]] %s1054_s0 }
   0x2   :  { %1066 = sst [smem:[#allocation14_spill]] %s1056_s2 }
   0x3   :  { %11 = vsyncpa [#allocation3], 0 }
   0x4   :  { %13 = vsyncpa [#allocation3 + $0x1], 0 }
   0x5   :  { %14 = vsyncpa [#allocation6], 0 }
   0x6   :  { %16 = vsyncpa [#allocation6 + $0x1], 0 }
   0x7   :  { %17 = vsyncpa [#allocation4], 0 }
   0x8   :  { %19 = vsyncpa [#allocation4 + $0x1], 0  ;;  %s839_s21 = smov 0   ;;  %s841_s22 = smov 0  }
   0x9   :  { %s843_s23 = smov 0   ;;  %s845_s24 = smov 0  }
   0xa LB: > { %s860_s25 = sadd.s32 4294967295, %s794_s24   ;;  %s536_s26 = sadd.s32 4294967294, %s794_s24   ;;  %s794_s24 = sphi %s845_s24, %s1087_s24   ;;  %s790_s23 = sphi %s843_s23, %s1086_s23   ;;  %s786_s22 = sphi %s841_s22, %s1085_s22   ;;  %s782_s21 = sphi %s839_s21, %s1084_s21  }
   0xb   : > { %p45_p0 = scmp.ne.s32.totalorder %s786_s22, %s782_s21  ;;  %p1061_p1 = scmp.eq.s32.totalorder %s860_s25, 0 }
   0xc   : > { %p185_p3 = scmp.eq.s32.totalorder %s536_s26, 1  ;;  %p537_p5 = scmp.ge.s32.totalorder %s794_s24, 1 }
   0xd   : > { %p869_p4 = por %p1061_p1, %p45_p0  ;;  %p192_p7 = scmp.lt.s32.totalorder %s794_s24, 3 }
   0xe   : > { %p874_p6 = por %p185_p3, %p45_p0  ;;  %s796_s30 = smov [#allocation7]  }
   0xf   : > { %s1067_s27 = scalar_select %p869_p4, 1, 0 }
  0x10   : > { %s1068_s28 = scalar_select %p874_p6, 1, 0 }
  0x11   : > { %p879_p8 = pnand %p537_p5, %p192_p7  ;;  %s204_s7 = sshll.u32 %s796_s30, 4  ;;  %s205_s7 = int_to_ptr.vmem [resolvable:$true] %s204_s7 }
  0x12   : > { %s893_s9 = sadd.s32 1, %s794_s24   ;;  %s32_s10 = sadd.s32 1, %s790_s23 }
  0x13   : > { %s1069_s29 = scalar_select %p879_p8, 1, 0 }
  0x14   : > { %p580_p9 = pneg %p879_p8  ;;  %s29_s11 = ssub.s32 %s794_s24, %s893_s9 }
  0x15   : > { %s651_s12 = scalar_lea.vmem %s205_s7, 256  ;;  %p659_p5 = scmp.lt.s32.totalorder %s205_s7, %s205_s7 }
  0x16   : > { %p888_p11 = pnand %p580_p9, %p1061_p1  ;;  %p652_p13 = scmp.ne.s32.totalorder %s205_s7, %s651_s12 }
  0x17   : > { %p660_p7 = scmp.lt.s32.totalorder %s651_s12, %s651_s12 }
  0x18   : > { %p642_p12 = pneg %p888_p11 }
  0x19   : > { %p661_p10 = por %p660_p7, %p659_p5 }
  0x1a   : > { %p654_p0 = pnand %p652_p13, %p642_p12 }
  0x1c   : > { %p655_p3 = pneg %p654_p0 }
  0x1e   : > { %p662_p2 = pnand %p661_p10, %p655_p3 }
  0x20   : > { %665 = shalt.err (!%p662_p2)
}
  0x21   : > { %s797_s13 = smov 64   ;;  %s798_s14 = smov 4  }
  0x22   : > { %s1071_s2 = sld [smem:[#allocation14_spill]]  ;;  %p30_p9 = scmp.eq.s32.totalorder %s29_s11, 0 }
  0x23   : > { %p39_p10 = scmp.ne.s32.totalorder %s790_s23, %s786_s22  ;;  %p40_p2 = scmp.eq.s32.totalorder %s794_s24, 0 }
  0x24   : > { %p596_p12 = scmp.lt.s32.totalorder %s794_s24, 2  ;;  %p1072_p0 = scmp.eq.s32.totalorder %s860_s25, 1 }
  0x25   : > { %s910_s17 = scalar_select %p30_p9, %s790_s23, %s32_s10  }
  0x26   : > { %p41_p13 = por %p40_p2, %p39_p10  ;;  %p914_p3 = por %p1072_p0, %p39_p10 }
  0x27   : > { %s919_s19 = sand.u32 1, %s790_s23   ;;  %s541_s20 = sshll.u32 %s794_s24, 6 }
  0x28   : > { %583 = dma.hbm_to_vmem [thread:$0]  (!%p888_p11), %s1071_s2, 256, %s205_s7, [#allocation6], %s797_s13, %s797_s13, %s798_s14  }
  0x29   : > { %s1073_s18 = scalar_select %p914_p3, 1, 0 }
  0x2a   : > { %s540_s26 = sshll.u32 %s919_s19, 2  ;;  %s1074_s0 = sld [smem:[#allocation13_spill]] }
  0x2b   : > { %s231_s10 = scalar_lea.vmem [#allocation2], %s540_s26  ;;  %p928_p11 = pnand %p596_p12, %p41_p13 }
  0x2c   : > { %s238_s11 = sshll.u32 %s231_s10, 4  ;;  %s228_s14 = scalar_lea.sflag [#allocation3], %s919_s19  ;;  %s239_s11 = int_to_ptr.vmem [resolvable:$true] %s238_s11 }
  0x2d   : > { %p668_p7 = pneg %p928_p11 }
  0x30   : > { %s926_s8 = scalar_lea.hbm %s1074_s0, %s541_s20  ;;  %s671_s26 = scalar_lea.hbm %s1074_s0, 128 }
  0x31   : > { %s666_s15 = scalar_lea.hbm %s926_s8, 64  ;;  %p672_p2 = scmp.lt.s32.totalorder %s926_s8, %s1074_s0 }
  0x32   : > { %p667_p5 = scmp.ne.s32.totalorder %s926_s8, %s666_s15  ;;  %p673_p12 = scmp.lt.s32.totalorder %s671_s26, %s666_s15 }
  0x34   : > { %p669_p9 = pnand %p668_p7, %p667_p5  ;;  %p674_p13 = por %p673_p12, %p672_p2 }
  0x36   : > { %p670_p10 = pneg %p669_p9 }
  0x38   : > { %p675_p0 = pnand %p674_p13, %p670_p10 }
  0x3a   : > { %678 = shalt.err (!%p675_p0)
}
  0x3b   : > { %s679_s10 = scalar_lea.vmem %s239_s11, 64  ;;  %s799_s13 = smov [#allocation2]  }
  0x3c   : > { %p680_p1 = scmp.ne.s32.totalorder %s239_s11, %s679_s10  ;;  %s684_s2 = sshll.u32 %s799_s13, 4  ;;  %s685_s2 = int_to_ptr.vmem [resolvable:$false] %s684_s2 }
  0x3d   : > { %s686_s16 = scalar_lea.vmem %s685_s2, 128  ;;  %p687_p9 = scmp.lt.s32.totalorder %s239_s11, %s685_s2 }
  0x3e   : > { %p682_p6 = pnand %p680_p1, %p668_p7  ;;  %p688_p3 = scmp.lt.s32.totalorder %s686_s16, %s679_s10 }
  0x40   : > { %p683_p5 = pneg %p682_p6  ;;  %p689_p4 = por %p688_p3, %p687_p9 }
  0x42   : > { %p690_p8 = pnand %p689_p4, %p683_p5 }
  0x44   : > { %693 = shalt.err (!%p690_p8)
}
  0x45   : > { %587 = dma.hbm_to_vmem [thread:$0]  (!%p928_p11), %s926_s8, 64, %s239_s11, %s228_s14  }
  0x46   : > { %s542_s15 = sshll.u32 %s919_s19, 3  ;;  %s543_s20 = sshll.u32 %s794_s24, 7 }
  0x47   : > { %s959_s13 = scalar_lea.hbm %s1055_s1, %s543_s20  ;;  %s249_s2 = scalar_lea.vmem [#allocation5], %s542_s15 }
  0x48   : > { %s256_s7 = sshll.u32 %s249_s2, 4  ;;  %s1076_s10 = sand.u32 1, %s794_s24   ;;  %s257_s7 = int_to_ptr.vmem [resolvable:$true] %s256_s7 }
  0x49   : > { %s246_s16 = scalar_lea.sflag [#allocation6], %s1076_s10  ;;  %s694_s0 = scalar_lea.hbm %s959_s13, 128 }
  0x4a   : > { %p695_p1 = scmp.ne.s32.totalorder %s959_s13, %s694_s0  ;;  %s699_s11 = scalar_lea.hbm %s1055_s1, 256 }
  0x4b   : > { %p700_p8 = scmp.lt.s32.totalorder %s959_s13, %s1055_s1  ;;  %p701_p3 = scmp.lt.s32.totalorder %s699_s11, %s694_s0 }
  0x4c   : > { %p697_p4 = pnand %p695_p1, %p668_p7 }
  0x4d   : > { %p702_p10 = por %p701_p3, %p700_p8 }
  0x4e   : > { %p698_p6 = pneg %p697_p4 }
  0x50   : > { %p703_p2 = pnand %p702_p10, %p698_p6 }
  0x52   : > { %706 = shalt.err (!%p703_p2)
}
  0x53   : > { %s707_s15 = scalar_lea.vmem %s257_s7, 128  ;;  %s800_s26 = smov [#allocation5]  }
  0x54   : > { %p708_p12 = scmp.ne.s32.totalorder %s257_s7, %s707_s15  ;;  %s712_s30 = sshll.u32 %s800_s26, 4  ;;  %s713_s30 = int_to_ptr.vmem [resolvable:$false] %s712_s30 }
  0x55   : > { %s714_s2 = scalar_lea.vmem %s713_s30, 256  ;;  %p715_p5 = scmp.lt.s32.totalorder %s257_s7, %s713_s30 }
  0x56   : > { %p710_p13 = pnand %p708_p12, %p668_p7  ;;  %p716_p9 = scmp.lt.s32.totalorder %s714_s2, %s707_s15 }
  0x58   : > { %p711_p0 = pneg %p710_p13  ;;  %p717_p1 = por %p716_p9, %p715_p5 }
  0x5a   : > { %p718_p4 = pnand %p717_p1, %p711_p0 }
  0x5c   : > { %721 = shalt.err (!%p718_p4)
}
  0x5d   : > { %590 = dma.hbm_to_vmem [thread:$0]  (!%p928_p11), %s959_s13, 128, %s257_s7, %s246_s16  }
  0x5e   : > { %p1077_p6 = scmp.ne.s32.totalorder %s1069_s29, 0 }
  0x5f   : > { %s984_s0 = sand.u32 (!%p1077_p6), 1, %s786_s22   ;;  %p1078_p7 = scmp.ne.s32.totalorder (!%p1077_p6), %s1067_s27, 0 }
  0x60   : > { %265 = sbr.rel (%p1077_p6) target bundleno = 635 (0x27b), region = 44  ;;  %s545_s10 = sshll.u32 (!%p1077_p6), %s984_s0, 2 }
  0x61   : > { %s268_s19 = scalar_lea.sflag (!%p1077_p6), [#allocation3], %s984_s0  ;;  %s271_s8 = scalar_lea.vmem (!%p1077_p6), [#allocation2], %s545_s10 }
  0x65   : > { %765 = dma.done.wait (%p1078_p7), %s268_s19, 64  }
  0x66   : > { %767 = vsyncadd (%p1078_p7), %s268_s19, 4294967232  ;;  %s276_s29 = sand.u32 1, %s860_s25   ;;  %s546_s12 = sshll.u32 %s984_s0, 3 }
  0x67   : > { %s277_s13 = scalar_lea.sflag [#allocation6], %s276_s29  ;;  %s280_s7 = scalar_lea.vmem [#allocation5], %s546_s12 }
  0x68   : > { %769 = dma.done.wait (%p1078_p7), %s277_s13, 128  }
  0x69   : > { %771 = vsyncadd (%p1078_p7), %s277_s13, 4294967168  ;;  %p1079_p11 = scmp.eq.s32.totalorder %s860_s25, 0 }
  0x6b   : > { %773 = dma.done.wait (%p1079_p11), [#allocation6], 256   ;;  %p1080_p8 = pmov %p1079_p11 }
  0x6c   : > { %v801_v0 = vmov 0.0   ;;  %vm802_vm0 = vmmov 0   ;;  %v636_v1 = vld [vmem:[#allocation7 + $0x8] sm:$0xff]   ;;  %v637_v2 = vld [vmem:[#allocation7] sm:$0xff]   ;;  %vm343_vm1 = vcmask 261120   ;;  %v387_v6 = vld [vmem:[%s280_s7] sm:$0xff] }
  0x6d   : > { %775 = vsyncadd (%p1080_p8), [#allocation6], 4294967040  ;;  %562 = vmatprep.subr.bf16.mxu0 %v801_v0  ;;  %566 = vmatprep.mubr.msk.bf16.mxu0 %vm802_vm0, %v801_v0  ;;  %v319_v3 = vld [vmem:[%s271_s8] sm:$0xf]  ;;  %s556_s26 = sshll.u32 %s860_s25, 7  ;;  %s317_s30 = scalar_lea.vmem [#allocation8], %s546_s12 }
  0x6e   : > { %563 = vmatpush3.bf16.msra.mxu0 %v636_v1  ;;  %v549_v4 = vld [vmem:[%s1057_s3] ss:$0 sm:$0xff]  ;;  %s434_s2 = sshll.u32 %s317_s30, 4  ;;  %s432_s8 = scalar_lea.hbm %s1060_s6, %s556_s26  ;;  %s435_s2 = int_to_ptr.vmem [resolvable:$true] %s434_s2 }
  0x6f   : > { %564 = vmatprep.subr.bf16.mxu0 %v801_v0  ;;  %v553_v21 = vld [vmem:[%s1058_s4] ss:$0 sm:$0xff]  ;;  %s421_s29 = scalar_lea.sflag [#allocation4], %s984_s0  ;;  %s722_s13 = scalar_lea.vmem %s435_s2, 128 }
  0x70   : > { %v554_v24 = vld [vmem:[%s1059_s5] ss:$0 sm:$0xff]  ;;  %p723_p3 = scmp.ne.s32.totalorder %s435_s2, %s722_s13  ;;  %p1081_p10 = scmp.ne.s32.totalorder %s1073_s18, 0 }
  0x71   : > { %s803_s7 = smov [#allocation8]  }
  0x72   : > { %565 = vmatpush3.bf16.msra.mxu0 %v637_v2  ;;  %p724_p2 = pnand %p723_p3, %p1081_p10  ;;  %s726_s25 = sshll.u32 %s803_s7, 4  ;;  %s727_s25 = int_to_ptr.vmem [resolvable:$false] %s726_s25 }
  0x73   : > { %s728_s12 = scalar_lea.vmem %s727_s25, 256  ;;  %p729_p13 = scmp.lt.s32.totalorder %s435_s2, %s727_s25 }
  0x74   : > { %p725_p12 = pneg %p724_p2  ;;  %p730_p0 = scmp.lt.s32.totalorder %s728_s12, %s722_s13 }
  0x75   : > { %567 = vmatmul.mubr.msk.bf16.vlgmr.msra.gmra.mxu0 %vm343_vm1, %v319_v3 }
  0x76   : > { %p731_p5 = por %p730_p0, %p729_p13 }
  0x78   : > { %p732_p9 = pnand %p731_p5, %p725_p12 }
 0x135   : > { %v381_v5 = vpop.f32.mrf.mxu0 }
 0x136   : > { %v382_v7 = vadd.f32 %v549_v4, %v381_v5 }
 0x137   : > { %v568_v8 = vpop.f32.mrf.mxu0 }
 0x138   : > { %v388_v9 = vadd.f32 %v387_v6, %v382_v7 }
 0x139   : > { %v384_v10 = vpop.f32.mrf.mxu0 }
 0x13a   : > { %v389_v11 = vsel %vm343_vm1, %v388_v9, 0.0 }
 0x13b   : > { %390 = vadd.xlane.f32.xlu0 %v389_v11  ;;  %v569_v12 = vpop.f32.mrf.mxu0 }
 0x1c4   : > { %v391_v13 = vpop.xlane.xlu0 %390 }
 0x1c5   : > { %v393_v14 = vmul.f32 0.03125, %v391_v13 }
 0x1c7   : > { %v394_v15 = vsub.f32 %v388_v9, %v393_v14 }
 0x1c9   : > { %v395_v16 = vmul.f32 %v394_v15, %v394_v15 }
 0x1cb   : > { %v396_v17 = vsel %vm343_vm1, %v395_v16, 0.0 }
 0x1cc   : > { %397 = vadd.xlane.f32.xlu0 %v396_v17 }
 0x255   : > { %v398_v18 = vpop.xlane.xlu0 %397 }
 0x256   : > { %v399_v19 = vmul.f32 0.03125, %v398_v18 }
 0x258   : > { %v400_v20 = vadd.f32 1e-12, %v399_v19 }
 0x25a   : > { %638 = vrsqrt.f32 %v400_v20 }
 0x267   : > { %v639_v22 = vpop.eup %638 }
 0x268   : > { %v409_v23 = vmul.f32 %v639_v22, %v553_v21 }
 0x26a   : > { %v410_v25 = vmul.f32 %v409_v23, %v394_v15 }
 0x26c   : > { %v418_v26 = vadd.f32 %v554_v24, %v410_v25 }
 0x26e   : > { %419 = vst.msk [vmem:[%s317_s30] sm:$0xff] %vm343_vm1, %v418_v26 }
 0x26f   : > { %735 = shalt.err (!%p732_p9)
}
 0x270   : > { %s736_s27 = scalar_lea.hbm %s432_s8, 128  ;;  %s740_s11 = scalar_lea.hbm %s1060_s6, 256 }
 0x271   : > { %p737_p1 = scmp.ne.s32.totalorder %s432_s8, %s736_s27  ;;  %p741_p7 = scmp.lt.s32.totalorder %s432_s8, %s1060_s6 }
 0x272   : > { %p742_p11 = scmp.lt.s32.totalorder %s740_s11, %s736_s27 }
 0x273   : > { %p738_p4 = pnand %p737_p1, %p1081_p10 }
 0x274   : > { %p743_p8 = por %p742_p11, %p741_p7 }
 0x275   : > { %p739_p6 = pneg %p738_p4 }
 0x277   : > { %p744_p3 = pnand %p743_p8, %p739_p6 }
 0x279   : > { %747 = shalt.err (!%p744_p3)
}
 0x27a   : > { %578 = dma.vmem_to_hbm [thread:$0]  (%p1081_p10), %s435_s2, 128, %s432_s8, %s421_s29  }
 0x27b PF: > { %s446_s15 = sand.u32 1, %s782_s21   ;;  %p1082_p2 = scmp.ne.s32.totalorder %s1068_s28, 0 }
 0x27c   : > { %p1083_p12 = scmp.ge.s32.totalorder %s794_s24, 2  ;;  %s447_s26 = scalar_lea.sflag [#allocation4], %s446_s15 }
 0x27e   : > { %p592_p13 = pnand %p1083_p12, %p1082_p2 }
 0x280   : > { %p593_p0 = pneg %p592_p13 }
 0x282   : > { %777 = dma.done.wait (%p593_p0), %s447_s26, 128  }
 0x283   : > { %779 = vsyncadd (%p593_p0), %s447_s26, 4294967168  ;;  %p22_p5 = scmp.ge.s32.totalorder %s893_s9, 4   ;;  %s1084_s21 = smov %s786_s22 }
 0x284   : > { %s1085_s22 = smov %s790_s23  ;;  %s1086_s23 = smov %s910_s17 }
 0x285   : > { %s1087_s24 = smov %s893_s9  ;;  %24 = sbr.rel (!%p22_p5) target bundleno = 10 (0xa), region = 106 }
 0x28a   :  { %452 = vsyncpa [#allocation3], 1 }
 0x28b   :  { %454 = vsyncpa [#allocation3 + $0x1], 1 }
 0x28c   :  { %455 = vsyncpa [#allocation6], 1 }
 0x28d   :  { %457 = vsyncpa [#allocation6 + $0x1], 1 }
 0x28e   :  { %458 = vsyncpa [#allocation4], 1 }
 0x28f   :  { %460 = vsyncpa [#allocation4 + $0x1], 1 }

</bundles_post_ra>
